<compile_context>
chip_gen: v5e
topology: v5e:2x2
jax: 0.10.0
libtpu: 0.0.40
codegen_flags: <defaults>
</compile_context>

<pallas_src>
import functools

import jax
import jax.numpy as jnp
from jax.experimental import pallas as pl
from jax.experimental.pallas import tpu as pltpu


def _round_up(x, m):
    return ((x + m - 1) // m) * m


def _linear_lse_kernel(x_ref, w_ref, b_ref, logits_ref, lse_ref, m_sc, l_sc):
    # x_ref: (TM, D) bf16   w_ref: (D, TV) bf16   b_ref: (1, TV) f32
    # logits_ref: (TM, TV) f32 out   lse_ref: (TM, 1) f32 out
    # m_sc / l_sc: (TM, 1) f32 running max / running sum-exp
    j = pl.program_id(1)

    @pl.when(j == 0)
    def _():
        m_sc[...] = jnp.full(m_sc.shape, -jnp.inf, m_sc.dtype)
        l_sc[...] = jnp.zeros(l_sc.shape, l_sc.dtype)

    logits = jnp.dot(x_ref[...], w_ref[...],
                     preferred_element_type=jnp.float32) + b_ref[...]
    logits_ref[...] = logits.astype(logits_ref.dtype)

    m_prev = m_sc[...]
    m_new = jnp.maximum(m_prev, jnp.max(logits, axis=-1, keepdims=True))
    l_sc[...] = (l_sc[...] * jnp.exp(m_prev - m_new)
                 + jnp.sum(jnp.exp(logits - m_new), axis=-1, keepdims=True))
    m_sc[...] = m_new

    @pl.when(j == pl.num_programs(1) - 1)
    def _():
        lse_ref[...] = m_sc[...] + jnp.log(l_sc[...])


def _normalize_kernel(logits_ref, lse_ref, o_ref):
    # logits_ref: (TM, TV) f32   lse_ref: (TM, 1) f32   o_ref: (TM, TV) out
    o_ref[...] = (logits_ref[...] - lse_ref[...]).astype(o_ref.dtype)


@functools.partial(jax.jit, static_argnames=("tile_m", "tile_v", "out_dtype"))
def generator_forward(x, w, b, *, tile_m=128, tile_v=512,
                      out_dtype=jnp.bfloat16):
    """x: (..., d_model), w: (d_model, vocab), b: (vocab,) -> log-probs (..., vocab)."""
    d_model = x.shape[-1]
    vocab = w.shape[-1]
    lead = x.shape[:-1]

    xf = x.reshape(-1, d_model)
    n = xf.shape[0]

    # Effective tile sizes: big by default, but do not blow up tiny inputs.
    tm = min(tile_m, _round_up(n, 8))
    tv = min(tile_v, _round_up(vocab, 128))
    n_pad = _round_up(n, tm)
    v_pad = _round_up(vocab, tv)

    if n_pad != n:
        xf = jnp.pad(xf, ((0, n_pad - n), (0, 0)))
    wp = w if v_pad == vocab else jnp.pad(w, ((0, 0), (0, v_pad - vocab)))
    bp = b if v_pad == vocab else jnp.pad(b, (0, v_pad - vocab),
                                          constant_values=-1e30)

    xb = xf.astype(jnp.bfloat16)
    wb = wp.astype(jnp.bfloat16)
    b2 = bp.reshape(1, v_pad).astype(jnp.float32)

    row_tiles = n_pad // tm
    v_tiles = v_pad // tv

    cparams = pltpu.CompilerParams(
        dimension_semantics=("parallel", "arbitrary"),
        vmem_limit_bytes=32 * 1024 * 1024,
    )

    # Pass 1: tiled matmul + online logsumexp over the vocab axis.
    logits_full, lse = pl.pallas_call(
        _linear_lse_kernel,
        out_shape=(
            jax.ShapeDtypeStruct((n_pad, v_pad), jnp.float32),
            jax.ShapeDtypeStruct((n_pad, 1), jnp.float32),
        ),
        grid_spec=pltpu.PrefetchScalarGridSpec(
            num_scalar_prefetch=0,
            grid=(row_tiles, v_tiles),
            in_specs=[
                pl.BlockSpec((tm, d_model), lambda i, j: (i, 0)),
                pl.BlockSpec((d_model, tv), lambda i, j: (0, j)),
                pl.BlockSpec((1, tv), lambda i, j: (0, j)),
            ],
            out_specs=[
                pl.BlockSpec((tm, tv), lambda i, j: (i, j)),
                pl.BlockSpec((tm, 1), lambda i, j: (i, 0)),
            ],
            scratch_shapes=[
                pltpu.VMEM((tm, 1), jnp.float32),
                pltpu.VMEM((tm, 1), jnp.float32),
            ],
        ),
        compiler_params=cparams,
    )(xb, wb, b2)

    # Pass 2: normalize each vocab tile with the per-row logsumexp.
    out = pl.pallas_call(
        _normalize_kernel,
        out_shape=jax.ShapeDtypeStruct((n_pad, v_pad), out_dtype),
        grid_spec=pltpu.PrefetchScalarGridSpec(
            num_scalar_prefetch=0,
            grid=(row_tiles, v_tiles),
            in_specs=[
                pl.BlockSpec((tm, tv), lambda i, j: (i, j)),
                pl.BlockSpec((tm, 1), lambda i, j: (i, 0)),
            ],
            out_specs=pl.BlockSpec((tm, tv), lambda i, j: (i, j)),
        ),
        compiler_params=pltpu.CompilerParams(
            dimension_semantics=("parallel", "parallel"),
            vmem_limit_bytes=32 * 1024 * 1024,
        ),
    )(logits_full, lse)

    out = out[:n, :vocab]
    return out.reshape(*lead, vocab)


if __name__ == "__main__":
    d_model = 32
    vocab = 128
    batch, seq = 2, 8

    key = jax.random.PRNGKey(0)
    kx, kw, kb = jax.random.split(key, 3)

    # Deterministic "Linear" params (uniform +/- 1/sqrt(d_model), like torch init).
    bound = 1.0 / (d_model ** 0.5)
    w = jax.random.uniform(kw, (d_model, vocab), jnp.float32, -bound, bound)
    b = jax.random.uniform(kb, (vocab,), jnp.float32, -bound, bound)
    x = jax.random.normal(kx, (batch, seq, d_model), jnp.float32)

    ref = jax.nn.log_softmax(x @ w + b, axis=-1)

    # Default path: bf16 inputs/outputs, f32 accumulation.
    out = generator_forward(x, w, b)
    out = jax.block_until_ready(out)
    assert out.shape == (batch, seq, vocab)
    assert out.dtype == jnp.bfloat16
    assert jnp.allclose(out.astype(jnp.float32), ref, atol=5e-2, rtol=0.0), \
        "bf16 output mismatch vs reference"

    # f32 output path (tighter check; error only from bf16 x/W rounding).
    out_f32 = generator_forward(x, w, b, out_dtype=jnp.float32)
    out_f32 = jax.block_until_ready(out_f32)
    assert jnp.allclose(out_f32, ref, atol=1e-2, rtol=0.0), \
        "f32 output mismatch vs reference"

    print("KERNEL_OK")
</pallas_src>

<mosaic_0001>
module attributes {stable_mosaic.version = 11 : i64} {
  func.func @_normalize_kernel(%arg0: i32, %arg1: i32, %arg2: memref<16x128xf32, #tpu.memory_space<vmem>>, %arg3: memref<16x1xf32, #tpu.memory_space<vmem>>, %arg4: memref<16x128xbf16, #tpu.memory_space<vmem>>) attributes {dimension_semantics = [#tpu.dimension_semantics<parallel>, #tpu.dimension_semantics<parallel>], iteration_bounds = array<i64: 1, 1>, scalar_prefetch = 0 : i64, scratch_operands = 0 : i64, tpu.core_type = #tpu.core_type<tc>, window_params = [{transform_indices = @transform_0, window_bounds = array<i64: 16, 128>}, {transform_indices = @transform_1, window_bounds = array<i64: 16, 1>}, {transform_indices = @transform_2, window_bounds = array<i64: 16, 128>}]} {
    %c0 = arith.constant 0 : index
    %c0_0 = arith.constant 0 : index
    %0 = vector.load %arg2[%c0, %c0_0] : memref<16x128xf32, #tpu.memory_space<vmem>>, vector<16x128xf32>
    %c0_1 = arith.constant 0 : index
    %c0_2 = arith.constant 0 : index
    %1 = vector.load %arg3[%c0_1, %c0_2] : memref<16x1xf32, #tpu.memory_space<vmem>>, vector<16x1xf32>
    %2 = vector.broadcast %1 : vector<16x1xf32> to vector<16x128xf32>
    %3 = arith.subf %0, %2 : vector<16x128xf32>
    %4 = arith.truncf %3 : vector<16x128xf32> to vector<16x128xbf16>
    %c0_3 = arith.constant 0 : index
    %c0_4 = arith.constant 0 : index
    %5 = vector.load %arg4[%c0_3, %c0_4] : memref<16x128xbf16, #tpu.memory_space<vmem>>, vector<16x128xbf16>
    tpu.vector_store %arg4[%c0_3, %c0_4], %4 {strides = array<i32>} : memref<16x128xbf16, #tpu.memory_space<vmem>>, vector<16x128xbf16>,
    return
  }
  func.func @transform_0(%arg0: i32, %arg1: i32) -> (i32, i32) {
    %c0_i32 = arith.constant 0 : i32
    return %arg0, %arg1 : i32, i32
  }
  func.func @transform_1(%arg0: i32, %arg1: i32) -> (i32, i32) {
    %c0_i32 = arith.constant 0 : i32
    %c0_i32_0 = arith.constant 0 : i32
    return %arg0, %c0_i32 : i32, i32
  }
  func.func @transform_2(%arg0: i32, %arg1: i32) -> (i32, i32) {
    %c0_i32 = arith.constant 0 : i32
    return %arg0, %arg1 : i32, i32
  }
}

module attributes {stable_mosaic.version = 11 : i64} {
  func.func @_linear_lse_kernel(%arg0: i32, %arg1: i32, %arg2: memref<16x32xbf16, #tpu.memory_space<vmem>>, %arg3: memref<32x128xbf16, #tpu.memory_space<vmem>>, %arg4: memref<1x128xf32, #tpu.memory_space<vmem>>, %arg5: memref<16x128xf32, #tpu.memory_space<vmem>>, %arg6: memref<16x1xf32, #tpu.memory_space<vmem>>, %arg7: memref<16x1xf32, #tpu.memory_space<vmem>>, %arg8: memref<16x1xf32, #tpu.memory_space<vmem>>) attributes {dimension_semantics = [#tpu.dimension_semantics<parallel>, #tpu.dimension_semantics<arbitrary>], iteration_bounds = array<i64: 1, 1>, scalar_prefetch = 0 : i64, scratch_operands = 2 : i64, tpu.core_type = #tpu.core_type<tc>, window_params = [{transform_indices = @transform_0, window_bounds = array<i64: 16, 32>}, {transform_indices = @transform_1, window_bounds = array<i64: 32, 128>}, {transform_indices = @transform_2, window_bounds = array<i64: 1, 128>}, {transform_indices = @transform_3, window_bounds = array<i64: 16, 128>}, {transform_indices = @transform_4, window_bounds = array<i64: 16, 1>}]} {
    %c0_i32 = arith.constant 0 : i32
    %0 = arith.cmpi eq, %arg1, %c0_i32 : i32
    %1 = arith.extui %0 : i1 to i32
    %c0_i32_0 = arith.constant 0 : i32
    %2 = arith.cmpi ne, %1, %c0_i32_0 : i32
    scf.if %2 {
      %cst_20 = arith.constant 0xFF800000 : f32
      %29 = vector.broadcast %cst_20 : f32 to vector<16x1xf32>
      %c0_21 = arith.constant 0 : index
      %c0_22 = arith.constant 0 : index
      %30 = vector.load %arg7[%c0_21, %c0_22] : memref<16x1xf32, #tpu.memory_space<vmem>>, vector<16x1xf32>
      tpu.vector_store %arg7[%c0_21, %c0_22], %29 {strides = array<i32>} : memref<16x1xf32, #tpu.memory_space<vmem>>, vector<16x1xf32>,
      %cst_23 = arith.constant 0.000000e+00 : f32
      %31 = vector.broadcast %cst_23 : f32 to vector<16x1xf32>
      %c0_24 = arith.constant 0 : index
      %c0_25 = arith.constant 0 : index
      %32 = vector.load %arg8[%c0_24, %c0_25] : memref<16x1xf32, #tpu.memory_space<vmem>>, vector<16x1xf32>
      tpu.vector_store %arg8[%c0_24, %c0_25], %31 {strides = array<i32>} : memref<16x1xf32, #tpu.memory_space<vmem>>, vector<16x1xf32>,
    } else {
    }
    %c0 = arith.constant 0 : index
    %c0_1 = arith.constant 0 : index
    %3 = vector.load %arg2[%c0, %c0_1] : memref<16x32xbf16, #tpu.memory_space<vmem>>, vector<16x32xbf16>
    %c0_2 = arith.constant 0 : index
    %c0_3 = arith.constant 0 : index
    %4 = vector.load %arg3[%c0_2, %c0_3] : memref<32x128xbf16, #tpu.memory_space<vmem>>, vector<32x128xbf16>
    %cst = arith.constant dense<0.000000e+00> : vector<16x128xf32>
    %5 = tpu.matmul %3, %4, %cst {dimension_numbers = #tpu.dot_dimension_numbers<[1], [0], [0], [1], [0, 0, 1, 1], [], []>} : vector<16x32xbf16>, vector<32x128xbf16>, vector<16x128xf32> -> vector<16x128xf32>
    %c0_4 = arith.constant 0 : index
    %c0_5 = arith.constant 0 : index
    %6 = vector.load %arg4[%c0_4, %c0_5] : memref<1x128xf32, #tpu.memory_space<vmem>>, vector<1x128xf32>
    %7 = vector.broadcast %6 : vector<1x128xf32> to vector<16x128xf32>
    %8 = arith.addf %5, %7 : vector<16x128xf32>
    %c0_6 = arith.constant 0 : index
    %c0_7 = arith.constant 0 : index
    %9 = vector.load %arg5[%c0_6, %c0_7] : memref<16x128xf32, #tpu.memory_space<vmem>>, vector<16x128xf32>
    tpu.vector_store %arg5[%c0_6, %c0_7], %8 {strides = array<i32>} : memref<16x128xf32, #tpu.memory_space<vmem>>, vector<16x128xf32>,
    %c0_8 = arith.constant 0 : index
    %c0_9 = arith.constant 0 : index
    %10 = vector.load %arg7[%c0_8, %c0_9] : memref<16x1xf32, #tpu.memory_space<vmem>>, vector<16x1xf32>
    %cst_10 = arith.constant dense<0xFF800000> : vector<16xf32>
    %11 = vector.multi_reduction <maximumf>, %8, %cst_10 [1] : vector<16x128xf32> to vector<16xf32>
    %12 = vector.shape_cast %11 : vector<16xf32> to vector<16x1xf32>
    %13 = arith.maximumf %10, %12 : vector<16x1xf32>
    %c0_11 = arith.constant 0 : index
    %c0_12 = arith.constant 0 : index
    %14 = vector.load %arg8[%c0_11, %c0_12] : memref<16x1xf32, #tpu.memory_space<vmem>>, vector<16x1xf32>
    %15 = arith.subf %10, %13 : vector<16x1xf32>
    %16 = math.exp %15 : vector<16x1xf32>
    %17 = arith.mulf %14, %16 : vector<16x1xf32>
    %18 = vector.broadcast %13 : vector<16x1xf32> to vector<16x128xf32>
    %19 = arith.subf %8, %18 : vector<16x128xf32>
    %20 = math.exp %19 : vector<16x128xf32>
    %cst_13 = arith.constant dense<0.000000e+00> : vector<16xf32>
    %21 = vector.multi_reduction <add>, %20, %cst_13 [1] : vector<16x128xf32> to vector<16xf32>
    %22 = vector.shape_cast %21 : vector<16xf32> to vector<16x1xf32>
    %23 = arith.addf %17, %22 : vector<16x1xf32>
    %c0_14 = arith.constant 0 : index
    %c0_15 = arith.constant 0 : index
    %24 = vector.load %arg8[%c0_14, %c0_15] : memref<16x1xf32, #tpu.memory_space<vmem>>, vector<16x1xf32>
    tpu.vector_store %arg8[%c0_14, %c0_15], %23 {strides = array<i32>} : memref<16x1xf32, #tpu.memory_space<vmem>>, vector<16x1xf32>,
    %c0_16 = arith.constant 0 : index
    %c0_17 = arith.constant 0 : index
    %25 = vector.load %arg7[%c0_16, %c0_17] : memref<16x1xf32, #tpu.memory_space<vmem>>, vector<16x1xf32>
    tpu.vector_store %arg7[%c0_16, %c0_17], %13 {strides = array<i32>} : memref<16x1xf32, #tpu.memory_space<vmem>>, vector<16x1xf32>,
    %c0_i32_18 = arith.constant 0 : i32
    %26 = arith.cmpi eq, %arg1, %c0_i32_18 : i32
    %27 = arith.extui %26 : i1 to i32
    %c0_i32_19 = arith.constant 0 : i32
    %28 = arith.cmpi ne, %27, %c0_i32_19 : i32
    scf.if %28 {
      %c0_20 = arith.constant 0 : index
      %c0_21 = arith.constant 0 : index
      %29 = vector.load %arg7[%c0_20, %c0_21] : memref<16x1xf32, #tpu.memory_space<vmem>>, vector<16x1xf32>
      %c0_22 = arith.constant 0 : index
      %c0_23 = arith.constant 0 : index
      %30 = vector.load %arg8[%c0_22, %c0_23] : memref<16x1xf32, #tpu.memory_space<vmem>>, vector<16x1xf32>
      %31 = math.log %30 : vector<16x1xf32>
      %32 = arith.addf %29, %31 : vector<16x1xf32>
      %c0_24 = arith.constant 0 : index
      %c0_25 = arith.constant 0 : index
      %33 = vector.load %arg6[%c0_24, %c0_25] : memref<16x1xf32, #tpu.memory_space<vmem>>, vector<16x1xf32>
      tpu.vector_store %arg6[%c0_24, %c0_25], %32 {strides = array<i32>} : memref<16x1xf32, #tpu.memory_space<vmem>>, vector<16x1xf32>,
    } else {
    }
    return
  }
  func.func @transform_0(%arg0: i32, %arg1: i32) -> (i32, i32) {
    %c0_i32 = arith.constant 0 : i32
    %c0_i32_0 = arith.constant 0 : i32
    return %arg0, %c0_i32 : i32, i32
  }
  func.func @transform_1(%arg0: i32, %arg1: i32) -> (i32, i32) {
    %c0_i32 = arith.constant 0 : i32
    %c0_i32_0 = arith.constant 0 : i32
    return %c0_i32, %arg1 : i32, i32
  }
  func.func @transform_2(%arg0: i32, %arg1: i32) -> (i32, i32) {
    %c0_i32 = arith.constant 0 : i32
    %c0_i32_0 = arith.constant 0 : i32
    return %c0_i32, %arg1 : i32, i32
  }
  func.func @transform_3(%arg0: i32, %arg1: i32) -> (i32, i32) {
    %c0_i32 = arith.constant 0 : i32
    return %arg0, %arg1 : i32, i32
  }
  func.func @transform_4(%arg0: i32, %arg1: i32) -> (i32, i32) {
    %c0_i32 = arith.constant 0 : i32
    %c0_i32_0 = arith.constant 0 : i32
    return %arg0, %c0_i32 : i32, i32
  }
}

</mosaic_0001>

<bundles_post_ra>
// kernel: generator_forward.3
= control target key start
LH: loop header
LB: loop body
LE: loop exit
PB: predicated region body
PF: predicated region fallthrough
CT: control target
= control target key end

     0   :  { %s120_s0 = inlined_call_operand.vmem [shape: f32[16,128], index: 0, kind: input, shape index: {}]   ;;  %s121_s1 = inlined_call_operand.vmem [shape: f32[16,1], index: 1, kind: input, shape index: {}]   ;;  %s122_s2 = inlined_call_operand.hbm [shape: bf16[16,128], index: 2, kind: output, shape index: {}]  }
   0x1   :  { %v14_v0 = vld [vmem:[%s121_s1] sm:$0xff] }
   0x2   :  { %7 = vsyncpa [#allocation3], 0  ;;  %v86_v1 = vmov 0   ;;  %v15_v2 = vld [vmem:[%s121_s1 + $0x8] sm:$0xff]  ;;  %v12_v4 = vld [vmem:[%s120_s0] sm:$0xff]  ;;  %s87_s17 = smov [#allocation2]  }
   0x3   :  { %59 = vset.pattern.permute.xlu0 %v86_v1  ;;  %v13_v5 = vld [vmem:[%s120_s0 + $0x8] sm:$0xff]  ;;  %s36_s18 = sshll.u32 %s87_s17, 4  ;;  %s38_s21 = sshll.u32 %s122_s2, 4  ;;  %s37_s18 = int_to_ptr.vmem [resolvable:$true] %s36_s18  ;;  %s39_s21 = int_to_ptr.hbm [resolvable:$true] %s38_s21 }
   0x4   :  { %18 = vperm.xlu0 %59, %v14_v0   ;;  %s88_s1 = smov 64   ;;  %s89_s22 = smov 4  }
   0xc   :  { %23 = vperm.xlu0 %59, %v15_v2  }
  0x76   :  { %v19_v3 = vpop.permute.xlu0 %18 }
  0x77   :  { %v26_v7 = vsub.f32 %v12_v4, %v19_v3 }
  0x7e   :  { %v24_v6 = vpop.permute.xlu0 %23 }
  0x7f   :  { %v27_v8 = vsub.f32 %v13_v5, %v24_v6 }
  0x81   :  { %v53_v9 = vpack.c.bf16 %v27_v8, %v26_v7 }
  0x83   :  { %54 = vst [vmem:[#allocation2] sm:$0xff] %v53_v9  }
  0x84   :  { %44 = dma.vmem_to_hbm [thread:$0]  %s37_s18, 128, %s39_s21, [#allocation3], %s88_s1, %s88_s1, %s89_s22  }
  0x85   :  { %84 = dma.done.wait [#allocation3], 128  }
  0x86   :  { %85 = vsyncadd [#allocation3], 4294967168 }
  0x87   :  { %49 = vsyncpa [#allocation3], 1 }

// kernel: generator_forward.2
= control target key start
LH: loop header
LB: loop body
LE: loop exit
PB: predicated region body
PF: predicated region fallthrough
CT: control target
= control target key end

     0   :  { %vm53_vm0 = vcmask 261120   ;;  %vm21_vm1 = vcmask 7168   ;;  %v175_v3 = vmov -inf   ;;  %v176_v9 = vmov 0   ;;  %s237_s1 = inlined_call_operand.vmem [shape: bf16[32,128], index: 1, kind: input, shape index: {}]   ;;  %s238_s2 = inlined_call_operand.vmem [shape: f32[1,128], index: 2, kind: input, shape index: {}]   ;;  %s239_s0 = inlined_call_operand.vmem [shape: bf16[16,32], index: 0, kind: input, shape index: {}]   ;;  %s240_s3 = inlined_call_operand.vmem [shape: f32[16,128], index: 3, kind: output, shape index: {0}]   ;;  %s241_s4 = inlined_call_operand.vmem [shape: f32[16,1], index: 4, kind: output, shape index: {1}]  }
   0x1   :  { %v156_v0 = vld [vmem:[%s237_s1 + $0x8] sm:$0xff]  ;;  %v155_v1 = vld [vmem:[%s237_s1] sm:$0xff]  ;;  %22 = vst.msk [vmem:[#allocation2] sm:$0xff] %vm21_vm1, %v175_v3  ;;  %160 = vset.pattern.permute.xlu1 %v176_v9  ;;  %161 = vset.pattern.permute.xlu0 %v176_v9  ;;  %v177_v10 = vmov 0.0  }
   0x2   :  { %63 = vmatpush.bf16.msra.mxu0 %v156_v0  ;;  %v154_v2 = vld [vmem:[%s239_s0] sm:$0xff]  ;;  %23 = vst.msk [vmem:[#allocation2 + $0x8] sm:$0xff] %vm21_vm1, %v175_v3 }
   0x3   :  { %v162_v4 = vld [vmem:[%s238_s2] ss:$0 sm:$0xff]  ;;  %24 = vst.msk [vmem:[#allocation3] sm:$0xff] %vm21_vm1, %v177_v10 }
   0x4   :  { %25 = vst.msk [vmem:[#allocation3 + $0x8] sm:$0xff] %vm21_vm1, %v177_v10 }
   0x6   :  { %64 = vmatpush.bf16.msra.mxu0 %v155_v1 }
   0x8   :  { %v73_v11 = vld [vmem:[#allocation2] sm:$0xff] }
   0x9   :  { %153 = vmatmul.msk.bf16.vlgmr.msra.gmra.mxu0 %vm53_vm0, %v154_v2  ;;  %v74_v15 = vld [vmem:[#allocation2 + $0x8] sm:$0xff] }
   0xa   :  { %v81_v30 = vld [vmem:[#allocation3] sm:$0xff] }
   0xb   :  { %v82_v35 = vld [vmem:[#allocation3 + $0x8] sm:$0xff] }
  0x86   :  { %v66_v5 = vpop.f32.mrf.mxu0 }
  0x87   :  { %v67_v6 = vadd.f32 %v162_v4, %v66_v5 }
  0x89   :  { %71 = vst [vmem:[%s240_s3] sm:$0xff] %v67_v6  ;;  %75 = vmax.xlane.f32.xlu0 %v67_v6 }
  0x8e   :  { %v68_v7 = vpop.f32.mrf.mxu0 }
  0x8f   :  { %v69_v8 = vadd.f32 %v162_v4, %v68_v7 }
  0x91   :  { %72 = vst [vmem:[%s240_s3 + $0x8] sm:$0xff] %v69_v8  ;;  %77 = vmax.xlane.f32.xlu0 %v69_v8 }
  0xfc   :  { %v76_v12 = vpop.xlane.xlu0 %75 }
  0xfd   :  { %v79_v13 = vmax.f32 %v73_v11, %v76_v12 }
  0xff   :  { %v83_v14 = vsub.f32 %v73_v11, %v79_v13  ;;  %116 = vst.msk [vmem:[#allocation2] sm:$0xff] %vm21_vm1, %v79_v13  ;;  %93 = vperm.xlu1 %160, %v79_v13  }
 0x101   :  { %v85_v27 = vmul.f32 1.442695, %v83_v14 }
 0x104   :  { %v78_v16 = vpop.xlane.xlu0 %77 }
 0x105   :  { %v80_v17 = vmax.f32 %v74_v15, %v78_v16 }
 0x106   :  { %v121_v43 = vld [vmem:[#allocation2] sm:$0xff] }
 0x107   :  { %v84_v18 = vsub.f32 %v74_v15, %v80_v17  ;;  %117 = vst.msk [vmem:[#allocation2 + $0x8] sm:$0xff] %vm21_vm1, %v80_v17  ;;  %98 = vperm.xlu1 %160, %v80_v17  }
 0x109   :  { %v87_v28 = vmul.f32 1.442695, %v84_v18 }
 0x10e   :  { %v122_v47 = vld [vmem:[#allocation2 + $0x8] sm:$0xff] }
 0x171   :  { %v94_v19 = vpop.permute.xlu1 %93 }
 0x172   :  { %v101_v20 = vsub.f32 %v67_v6, %v94_v19 }
 0x174   :  { %v103_v21 = vmul.f32 1.442695, %v101_v20 }
 0x176   :  { %163 = vpow2.f32 %v103_v21 }
 0x179   :  { %v99_v22 = vpop.permute.xlu1 %98 }
 0x17a   :  { %v102_v23 = vsub.f32 %v69_v8, %v99_v22 }
 0x17c   :  { %v164_v24 = vpop.eup %163  ;;  %v105_v25 = vmul.f32 1.442695, %v102_v23 }
 0x17d   :  { %107 = vadd.xlane.f32.xlu2 %v164_v24 }
 0x17e   :  { %165 = vpow2.f32 %v105_v25 }
 0x17f   :  { %167 = vpow2.f32 %v85_v27 }
 0x180   :  { %169 = vpow2.f32 %v87_v28 }
 0x184   :  { %v166_v26 = vpop.eup %165 }
 0x185   :  { %109 = vadd.xlane.f32.xlu2 %v166_v26  ;;  %v168_v29 = vpop.eup %167 }
 0x186   :  { %v89_v31 = vmul.f32 %v168_v29, %v81_v30  ;;  %v170_v34 = vpop.eup %169 }
 0x187   :  { %v90_v36 = vmul.f32 %v170_v34, %v82_v35 }
 0x1f0   :  { %v108_v32 = vpop.xlane.xlu2 %107 }
 0x1f1   :  { %v111_v33 = vadd.f32 %v108_v32, %v89_v31 }
 0x1f3   :  { %114 = vst.msk [vmem:[#allocation3] sm:$0xff] %vm21_vm1, %v111_v33 }
 0x1f8   :  { %v110_v37 = vpop.xlane.xlu2 %109 }
 0x1f9   :  { %v112_v38 = vadd.f32 %v110_v37, %v90_v36 }
 0x1fa   :  { %v123_v39 = vld [vmem:[#allocation3] sm:$0xff] }
 0x1fb   :  { %171 = vlog2.f32 %v123_v39  ;;  %115 = vst.msk [vmem:[#allocation3 + $0x8] sm:$0xff] %vm21_vm1, %v112_v38 }
 0x201   :  { %v172_v40 = vpop.eup %171 }
 0x202   :  { %v126_v41 = vmul.f32 0.6931472, %v172_v40  ;;  %v124_v42 = vld [vmem:[#allocation3 + $0x8] sm:$0xff] }
 0x203   :  { %173 = vlog2.f32 %v124_v42 }
 0x204   :  { %v129_v44 = vadd.f32 %v126_v41, %v121_v43 }
 0x206   :  { %131 = vst.msk [vmem:[%s241_s4] sm:$0xff] %vm21_vm1, %v129_v44 }
 0x209   :  { %v174_v45 = vpop.eup %173 }
 0x20a   :  { %v128_v46 = vmul.f32 0.6931472, %v174_v45 }
 0x20c   :  { %v130_v48 = vadd.f32 %v128_v46, %v122_v47 }
 0x20e   :  { %132 = vst.msk [vmem:[%s241_s4 + $0x8] sm:$0xff] %vm21_vm1, %v130_v48 }

</bundles_post_ra>
